<compile_context>
chip_gen: v7x
topology: tpu7x:2x2x1
jax: 0.10.0
libtpu: 0.0.40
codegen_flags: <defaults>
</compile_context>

<pallas_src>
import functools

import jax
import jax.numpy as jnp
from jax.experimental import pallas as pl
from jax.experimental.pallas import tpu as pltpu

# ----------------------------- small BERT config -----------------------------
VOCAB = 100
TYPE_VOCAB = 2
MAX_POS = 16
HIDDEN = 32
N_HEADS = 4
HEAD_DIM = HIDDEN // N_HEADS
INTERMEDIATE = 64
N_LAYERS = 2
N_CLASSES = 3
LN_EPS = 1e-12
DROPOUT_P = 0.3
CLS_PAD = 128  # lane-dense padded classifier width; sliced back to N_CLASSES outside


# ------------------------------ in-kernel helpers ------------------------------
def _ln(x, g, b):
    mu = jnp.mean(x, axis=-1, keepdims=True)
    xc = x - mu
    var = jnp.mean(xc * xc, axis=-1, keepdims=True)
    return xc * jax.lax.rsqrt(var + LN_EPS) * g + b


def _gelu(y):
    # TODO(synk): HF bert-base uses exact erf GELU; tanh approximation used here.
    return 0.5 * y * (1.0 + jnp.tanh(0.7978845608028654 * (y + 0.044715 * y * y * y)))


# ------------------------------ Pallas kernels --------------------------------
def _emb_layernorm_kernel(x_ref, g_ref, b_ref, o_ref):
    o_ref[...] = _ln(x_ref[...].astype(jnp.float32), g_ref[...], b_ref[...]).astype(o_ref.dtype)


def emb_layernorm(x, gamma, beta):
    M, H = x.shape
    return pl.pallas_call(
        _emb_layernorm_kernel,
        out_shape=jax.ShapeDtypeStruct((M, H), jnp.float32),
        grid=(1,),
        in_specs=[
            pl.BlockSpec((M, H), lambda i: (0, 0)),
            pl.BlockSpec((1, H), lambda i: (0, 0)),
            pl.BlockSpec((1, H), lambda i: (0, 0)),
        ],
        out_specs=pl.BlockSpec((M, H), lambda i: (0, 0)),
    )(x, gamma.reshape(1, H), beta.reshape(1, H))


def _attn_block_kernel(x_ref, m_ref, wqkv_ref, bqkv_ref, wo_ref, bo_ref, g_ref, b_ref, o_ref):
    # Fused: QKV projection + per-head attention + output projection + residual + LayerNorm.
    x = x_ref[...]                                                   # (S, H)
    qkv = jnp.dot(x, wqkv_ref[...], preferred_element_type=jnp.float32) + bqkv_ref[...]  # (S, 3H)
    m = m_ref[0]                                                     # (1, S) additive mask
    wo = wo_ref[...]                                                 # (H, H)

    attn = jnp.zeros((x.shape[0], HIDDEN), jnp.float32)
    for h in range(N_HEADS):                                         # unrolled; NH small
        q = qkv[:, h * HEAD_DIM:(h + 1) * HEAD_DIM]                  # scale folded into Wq
        k = qkv[:, HIDDEN + h * HEAD_DIM: HIDDEN + (h + 1) * HEAD_DIM]
        v = qkv[:, 2 * HIDDEN + h * HEAD_DIM: 2 * HIDDEN + (h + 1) * HEAD_DIM]
        # q . k^T without an in-kernel transpose (contract last dims of both).
        s = jax.lax.dot_general(q, k, (((1,), (1,)), ((), ())),
                                preferred_element_type=jnp.float32) + m
        s = s - jnp.max(s, axis=-1, keepdims=True)
        p = jnp.exp(s)
        p = p * pl.reciprocal(jnp.sum(p, axis=-1, keepdims=True), approx=True)
        ctx = jnp.dot(p, v, preferred_element_type=jnp.float32)      # (S, D)
        # Output projection accumulated per head (avoids a head concat).
        attn = attn + jnp.dot(ctx, wo[h * HEAD_DIM:(h + 1) * HEAD_DIM, :],
                              preferred_element_type=jnp.float32)

    attn = attn + bo_ref[...]
    o_ref[...] = _ln(x + attn, g_ref[...], b_ref[...]).astype(o_ref.dtype)


def attention_block(x, mask_add, w_qkv, b_qkv, w_o, b_o, ln_g, ln_b, B, S):
    H = HIDDEN
    return pl.pallas_call(
        _attn_block_kernel,
        out_shape=jax.ShapeDtypeStruct((B * S, H), jnp.float32),
        grid=(B,),
        in_specs=[
            pl.BlockSpec((S, H), lambda b: (b, 0)),          # per-batch token rows
            pl.BlockSpec((1, 1, S), lambda b: (b, 0, 0)),    # per-batch additive mask
            pl.BlockSpec((H, 3 * H), lambda b: (0, 0)),
            pl.BlockSpec((1, 3 * H), lambda b: (0, 0)),
            pl.BlockSpec((H, H), lambda b: (0, 0)),
            pl.BlockSpec((1, H), lambda b: (0, 0)),
            pl.BlockSpec((1, H), lambda b: (0, 0)),
            pl.BlockSpec((1, H), lambda b: (0, 0)),
        ],
        out_specs=pl.BlockSpec((S, H), lambda b: (b, 0)),
        compiler_params=pltpu.CompilerParams(dimension_semantics=("parallel",)),
    )(x, mask_add, w_qkv, b_qkv.reshape(1, 3 * H), w_o, b_o.reshape(1, H),
      ln_g.reshape(1, H), ln_b.reshape(1, H))


def _ffn_block_kernel(x_ref, w1_ref, b1_ref, w2_ref, b2_ref, g_ref, b_ref, o_ref):
    # Fused: FFN-1 + GELU + FFN-2 + residual + LayerNorm.
    x = x_ref[...]                                                    # (M, H)
    h = jnp.dot(x, w1_ref[...], preferred_element_type=jnp.float32) + b1_ref[...]
    h = _gelu(h)
    y = jnp.dot(h, w2_ref[...], preferred_element_type=jnp.float32) + b2_ref[...]
    o_ref[...] = _ln(x + y, g_ref[...], b_ref[...]).astype(o_ref.dtype)


def ffn_block(x, w1, b1, w2, b2, ln_g, ln_b):
    M, H = x.shape
    I = w1.shape[1]
    return pl.pallas_call(
        _ffn_block_kernel,
        out_shape=jax.ShapeDtypeStruct((M, H), jnp.float32),
        grid=(1,),
        in_specs=[
            pl.BlockSpec((M, H), lambda i: (0, 0)),
            pl.BlockSpec((H, I), lambda i: (0, 0)),
            pl.BlockSpec((1, I), lambda i: (0, 0)),
            pl.BlockSpec((I, H), lambda i: (0, 0)),
            pl.BlockSpec((1, H), lambda i: (0, 0)),
            pl.BlockSpec((1, H), lambda i: (0, 0)),
            pl.BlockSpec((1, H), lambda i: (0, 0)),
        ],
        out_specs=pl.BlockSpec((M, H), lambda i: (0, 0)),
    )(x, w1, b1.reshape(1, I), w2, b2.reshape(1, H), ln_g.reshape(1, H), ln_b.reshape(1, H))


def _head_kernel(cls_ref, pw_ref, pb_ref, cw_ref, cb_ref, o_ref, *, p, seed, training):
    # Fused: pooler (tanh) + dropout + classifier matmul (lane-dense padded output).
    pooled = jnp.tanh(jnp.dot(cls_ref[...], pw_ref[...],
                              preferred_element_type=jnp.float32) + pb_ref[...])
    if training and p > 0.0:
        # TODO(synk): dropout mask is a deterministic integer-hash PRNG, not torch's RNG stream.
        shape = pooled.shape
        r = (jax.lax.broadcasted_iota(jnp.uint32, shape, 0) * jnp.uint32(shape[1])
             + jax.lax.broadcasted_iota(jnp.uint32, shape, 1))
        r = r + jnp.uint32(seed & 0xFFFFFFFF) * jnp.uint32(0x9E3779B9)
        r = r ^ (r >> 16)
        r = r * jnp.uint32(0x7FEB352D)
        r = r ^ (r >> 15)
        r = r * jnp.uint32(0x846CA68B)
        r = r ^ (r >> 16)
        r31 = (r >> jnp.uint32(1)).astype(jnp.int32)                  # [0, 2^31)
        keep = (r31 < jnp.int32(int((1.0 - p) * 2147483648.0))).astype(jnp.float32)
        pooled = pooled * keep * (1.0 / (1.0 - p))
    logits = jnp.dot(pooled, cw_ref[...], preferred_element_type=jnp.float32) + cb_ref[...]
    o_ref[...] = logits.astype(o_ref.dtype)


def head(cls, pool_w, pool_b, cls_w_pad, cls_b_pad, *, seed, p, training):
    B, H = cls.shape
    NP = cls_w_pad.shape[1]
    return pl.pallas_call(
        functools.partial(_head_kernel, p=float(p), seed=int(seed), training=bool(training)),
        out_shape=jax.ShapeDtypeStruct((B, NP), jnp.float32),
        grid=(1,),
        in_specs=[
            pl.BlockSpec((B, H), lambda i: (0, 0)),
            pl.BlockSpec((H, H), lambda i: (0, 0)),
            pl.BlockSpec((1, H), lambda i: (0, 0)),
            pl.BlockSpec((H, NP), lambda i: (0, 0)),
            pl.BlockSpec((1, NP), lambda i: (0, 0)),
        ],
        out_specs=pl.BlockSpec((B, NP), lambda i: (0, 0)),
    )(cls, pool_w, pool_b.reshape(1, H), cls_w_pad, cls_b_pad.reshape(1, NP))


# ------------------------------ parameter setup --------------------------------
def init_params(key):
    ks = iter(jax.random.split(key, 16 + 12 * N_LAYERS))

    def nrm(shape):
        return jax.random.normal(next(ks), shape, jnp.float32) * 0.02

    cls_w = nrm((HIDDEN, N_CLASSES))
    cls_b = jnp.zeros((N_CLASSES,), jnp.float32)
    params = {
        "word_emb": nrm((VOCAB, HIDDEN)),
        "pos_emb": nrm((MAX_POS, HIDDEN)),
        "type_emb": nrm((TYPE_VOCAB, HIDDEN)),
        "emb_ln_g": jnp.ones((HIDDEN,), jnp.float32),
        "emb_ln_b": jnp.zeros((HIDDEN,), jnp.float32),
        "layers": [],
        "pool_w": nrm((HIDDEN, HIDDEN)),
        "pool_b": jnp.zeros((HIDDEN,), jnp.float32),
        # Classifier weights padded to 128 output lanes (lane-dense store); real
        # logits are the first N_CLASSES columns.
        "cls_w_pad": jnp.zeros((HIDDEN, CLS_PAD), jnp.float32).at[:, :N_CLASSES].set(cls_w),
        "cls_b_pad": jnp.zeros((CLS_PAD,), jnp.float32).at[:N_CLASSES].set(cls_b),
    }
    scale = 1.0 / (HEAD_DIM ** 0.5)
    for _ in range(N_LAYERS):
        w_qkv = nrm((HIDDEN, 3 * HIDDEN))
        b_qkv = jnp.zeros((3 * HIDDEN,), jnp.float32)
        # Fold 1/sqrt(head_dim) into the Q projection (parameter-side transform).
        w_qkv = w_qkv.at[:, :HIDDEN].multiply(scale)
        b_qkv = b_qkv.at[:HIDDEN].multiply(scale)
        params["layers"].append(
            {
                "w_qkv": w_qkv,
                "b_qkv": b_qkv,
                "w_o": nrm((HIDDEN, HIDDEN)),
                "b_o": jnp.zeros((HIDDEN,), jnp.float32),
                "ln1_g": jnp.ones((HIDDEN,), jnp.float32),
                "ln1_b": jnp.zeros((HIDDEN,), jnp.float32),
                "w_ff1": nrm((HIDDEN, INTERMEDIATE)),
                "b_ff1": jnp.zeros((INTERMEDIATE,), jnp.float32),
                "w_ff2": nrm((INTERMEDIATE, HIDDEN)),
                "b_ff2": jnp.zeros((HIDDEN,), jnp.float32),
                "ln2_g": jnp.ones((HIDDEN,), jnp.float32),
                "ln2_b": jnp.zeros((HIDDEN,), jnp.float32),
            }
        )
    return params


# ------------------------------ forward pass ------------------------------------
def bert_base_forward(params, input_ids, attention_mask, token_type_ids,
                      dropout_seed=0, training=True):
    B, S = input_ids.shape
    H = HIDDEN

    # embeddings (gather glue) + LayerNorm kernel
    x = (
        params["word_emb"][input_ids]
        + params["pos_emb"][jnp.arange(S)][None, :, :]
        + params["type_emb"][token_type_ids]
    ).reshape(B * S, H)
    x = emb_layernorm(x, params["emb_ln_g"], params["emb_ln_b"])

    # additive attention mask kept at (B, 1, S); indexed per batch by the BlockSpec.
    mask_add = ((1.0 - attention_mask.astype(jnp.float32)) * -10000.0).reshape(B, 1, S)

    for lp in params["layers"]:
        x = attention_block(x, mask_add, lp["w_qkv"], lp["b_qkv"], lp["w_o"], lp["b_o"],
                            lp["ln1_g"], lp["ln1_b"], B, S)
        x = ffn_block(x, lp["w_ff1"], lp["b_ff1"], lp["w_ff2"], lp["b_ff2"],
                      lp["ln2_g"], lp["ln2_b"])

    # pooler + dropout(p=0.3) + classifier in one fused kernel
    cls = x.reshape(B, S, H)[:, 0, :]                                    # (B, H)
    logits_pad = head(cls, params["pool_w"], params["pool_b"],
                      params["cls_w_pad"], params["cls_b_pad"],
                      seed=dropout_seed, p=DROPOUT_P, training=training)
    return logits_pad[:, :N_CLASSES]


# ------------------------------------ main ---------------------------------------
if __name__ == "__main__":
    key = jax.random.PRNGKey(0)
    pkey, ikey = jax.random.split(key, 2)

    B, S = 2, 8
    params = init_params(pkey)

    input_ids = jax.random.randint(ikey, (B, S), 0, VOCAB, dtype=jnp.int32)
    attention_mask = jnp.ones((B, S), jnp.int32).at[1, 6:].set(0)   # padding on row 1
    token_type_ids = jnp.zeros((B, S), jnp.int32)

    logits = bert_base_forward(params, input_ids, attention_mask, token_type_ids,
                               dropout_seed=0, training=True)
    logits = jax.block_until_ready(logits)

    assert logits.shape == (B, N_CLASSES)
    assert bool(jnp.all(jnp.isfinite(logits)))
    print("KERNEL_OK")
</pallas_src>

<mosaic_0001>
module attributes {stable_mosaic.version = 11 : i64} {
  func.func @_emb_layernorm_kernel(%arg0: i32, %arg1: memref<16x32xf32, #tpu.memory_space<vmem>>, %arg2: memref<1x32xf32, #tpu.memory_space<vmem>>, %arg3: memref<1x32xf32, #tpu.memory_space<vmem>>, %arg4: memref<16x32xf32, #tpu.memory_space<vmem>>) attributes {dimension_semantics = [#tpu.dimension_semantics<arbitrary>], iteration_bounds = array<i64: 1>, scalar_prefetch = 0 : i64, scratch_operands = 0 : i64, tpu.core_type = #tpu.core_type<tc>, window_params = [{pipeline_mode = #tpu.pipeline_mode<synchronous>, transform_indices = @transform_0, window_bounds = array<i64: 16, 32>}, {pipeline_mode = #tpu.pipeline_mode<synchronous>, transform_indices = @transform_1, window_bounds = array<i64: 1, 32>}, {pipeline_mode = #tpu.pipeline_mode<synchronous>, transform_indices = @transform_2, window_bounds = array<i64: 1, 32>}, {pipeline_mode = #tpu.pipeline_mode<synchronous>, transform_indices = @transform_3, window_bounds = array<i64: 16, 32>}]} {
    %c0 = arith.constant 0 : index
    %c0_0 = arith.constant 0 : index
    %0 = vector.load %arg1[%c0, %c0_0] : memref<16x32xf32, #tpu.memory_space<vmem>>, vector<16x32xf32>
    %c0_1 = arith.constant 0 : index
    %c0_2 = arith.constant 0 : index
    %1 = vector.load %arg2[%c0_1, %c0_2] : memref<1x32xf32, #tpu.memory_space<vmem>>, vector<1x32xf32>
    %c0_3 = arith.constant 0 : index
    %c0_4 = arith.constant 0 : index
    %2 = vector.load %arg3[%c0_3, %c0_4] : memref<1x32xf32, #tpu.memory_space<vmem>>, vector<1x32xf32>
    %cst = arith.constant dense<0.000000e+00> : vector<16xf32>
    %3 = vector.multi_reduction <add>, %0, %cst [1] : vector<16x32xf32> to vector<16xf32>
    %4 = vector.shape_cast %3 : vector<16xf32> to vector<16x1xf32>
    %cst_5 = arith.constant 3.200000e+01 : f32
    %5 = vector.broadcast %cst_5 : f32 to vector<16x1xf32>
    %6 = arith.divf %4, %5 : vector<16x1xf32>
    %7 = vector.broadcast %6 : vector<16x1xf32> to vector<16x32xf32>
    %8 = arith.subf %0, %7 : vector<16x32xf32>
    %9 = arith.mulf %8, %8 : vector<16x32xf32>
    %cst_6 = arith.constant dense<0.000000e+00> : vector<16xf32>
    %10 = vector.multi_reduction <add>, %9, %cst_6 [1] : vector<16x32xf32> to vector<16xf32>
    %11 = vector.shape_cast %10 : vector<16xf32> to vector<16x1xf32>
    %cst_7 = arith.constant 3.200000e+01 : f32
    %12 = vector.broadcast %cst_7 : f32 to vector<16x1xf32>
    %13 = arith.divf %11, %12 : vector<16x1xf32>
    %cst_8 = arith.constant 9.99999996E-13 : f32
    %14 = vector.broadcast %cst_8 : f32 to vector<16x1xf32>
    %15 = arith.addf %13, %14 : vector<16x1xf32>
    %16 = math.rsqrt %15 : vector<16x1xf32>
    %17 = vector.broadcast %16 : vector<16x1xf32> to vector<16x32xf32>
    %18 = arith.mulf %8, %17 : vector<16x32xf32>
    %19 = vector.broadcast %1 : vector<1x32xf32> to vector<16x32xf32>
    %20 = arith.mulf %18, %19 : vector<16x32xf32>
    %21 = vector.broadcast %2 : vector<1x32xf32> to vector<16x32xf32>
    %22 = arith.addf %20, %21 : vector<16x32xf32>
    %c0_9 = arith.constant 0 : index
    %c0_10 = arith.constant 0 : index
    %23 = vector.load %arg4[%c0_9, %c0_10] : memref<16x32xf32, #tpu.memory_space<vmem>>, vector<16x32xf32>
    tpu.vector_store %arg4[%c0_9, %c0_10], %22 {strides = array<i32>} : memref<16x32xf32, #tpu.memory_space<vmem>>, vector<16x32xf32>,
    return
  }
  func.func @transform_0(%arg0: i32) -> (i32, i32) {
    %c0_i32 = arith.constant 0 : i32
    %c0_i32_0 = arith.constant 0 : i32
    %c0_i32_1 = arith.constant 0 : i32
    return %c0_i32, %c0_i32_0 : i32, i32
  }
  func.func @transform_1(%arg0: i32) -> (i32, i32) {
    %c0_i32 = arith.constant 0 : i32
    %c0_i32_0 = arith.constant 0 : i32
    %c0_i32_1 = arith.constant 0 : i32
    return %c0_i32, %c0_i32_0 : i32, i32
  }
  func.func @transform_2(%arg0: i32) -> (i32, i32) {
    %c0_i32 = arith.constant 0 : i32
    %c0_i32_0 = arith.constant 0 : i32
    %c0_i32_1 = arith.constant 0 : i32
    return %c0_i32, %c0_i32_0 : i32, i32
  }
  func.func @transform_3(%arg0: i32) -> (i32, i32) {
    %c0_i32 = arith.constant 0 : i32
    %c0_i32_0 = arith.constant 0 : i32
    %c0_i32_1 = arith.constant 0 : i32
    return %c0_i32, %c0_i32_0 : i32, i32
  }
}

</mosaic_0001>

<bundles_post_ra>
// kernel: tpu_custom_call.1
= control target key start
LH: loop header
LB: loop body
LE: loop exit
PB: predicated region body
PF: predicated region fallthrough
CT: control target
= control target key end

     0   :  { %8 = vsyncpa [#allocation3], 0  ;;  %s220_s0 = inlined_call_operand.hbm [shape: f32[16,32], index: 0, kind: input, shape index: {}]   ;;  %s221_s1 = inlined_call_operand.vmem [shape: f32[1,32], index: 1, kind: input, shape index: {}]   ;;  %s222_s2 = inlined_call_operand.vmem [shape: f32[1,32], index: 2, kind: input, shape index: {}]   ;;  %s223_s3 = inlined_call_operand.hbm [shape: f32[16,32], index: 3, kind: output, shape index: {}]  }
   0x1   :  { %9 = vsyncpa [#allocation4], 0  ;;  %s154_s12 = smov [#allocation2]   ;;  %s106_s16 = scalar_lea.hbm %s220_s0, 256 }
   0x2   :  { %s15_s13 = sshll.u32 %s154_s12, 4  ;;  %p107_p0 = scmp.ne.s32.totalorder %s220_s0, %s106_s16  ;;  %s16_s13 = int_to_ptr.vmem [resolvable:$true] %s15_s13 }
   0x3   :  { %p110_p1 = scmp.lt.u32.totalorder %s106_s16, %s220_s0 }
   0x5   :  { %p112_p2 = pnand %p110_p1, %p107_p0 }
   0x7   :  { %115 = shalt.err (!%p112_p2)
}
   0x8   :  { %s116_s21 = scalar_lea.vmem %s16_s13, 256  ;;  %p121_p4 = scmp.lt.s32.totalorder %s16_s13, %s16_s13 }
   0x9   :  { %p117_p3 = scmp.ne.s32.totalorder %s16_s13, %s116_s21  ;;  %p122_p5 = scmp.lt.s32.totalorder %s116_s21, %s116_s21 }
   0xb   :  { %p123_p6 = por %p122_p5, %p121_p4 }
   0xd   :  { %p124_p7 = pnand %p123_p6, %p117_p3 }
   0xf   :  { %127 = shalt.err (!%p124_p7)
}
  0x10   :  { %s155_s22 = smov 128   ;;  %s156_s23 = smov 8  }
  0x11   :  { %21 = dma.hbm_to_vmem [thread:$0]  %s220_s0, 256, %s16_s13, [#allocation3], %s155_s22, %s155_s22, %s156_s23  }
  0x12   :  { %150 = dma.done.wait [#allocation3], 256  }
  0x13   :  { %151 = vsyncadd [#allocation3], 4294967040  ;;  %vm33_vm0 = vcmask 261120   ;;  %v29_v0 = vld [vmem:[#allocation2] sm:$0xff]  ;;  %v30_v1 = vld [vmem:[#allocation2 + $0x8] sm:$0xff]  ;;  %s157_s29 = smov [#allocation5]  }
  0x14   :  { %v34_v2 = vsel %vm33_vm0, %v29_v0, 0.0  ;;  %v37_v3 = vsel %vm33_vm0, %v30_v1, 0.0  ;;  %v96_v21 = vld [vmem:[%s221_s1] ss:$0 sm:$0xff]  ;;  %s84_s30 = sshll.u32 %s157_s29, 4  ;;  %s85_s30 = int_to_ptr.vmem [resolvable:$true] %s84_s30 }
  0x15   :  { %35 = vadd.xlane.f32.xlu0 %v34_v2  ;;  %v97_v23 = vld [vmem:[%s222_s2] ss:$0 sm:$0xff]  ;;  %s128_s4 = scalar_lea.vmem %s85_s30, 256  ;;  %p133_p9 = scmp.lt.s32.totalorder %s85_s30, %s85_s30 }
  0x16   :  { %p129_p8 = scmp.ne.s32.totalorder %s85_s30, %s128_s4  ;;  %p134_p10 = scmp.lt.s32.totalorder %s128_s4, %s128_s4 }
  0x18   :  { %p135_p11 = por %p134_p10, %p133_p9 }
  0x19   :  { %38 = vadd.xlane.f32.xlu0 %v37_v3 }
  0x1a   :  { %p136_p12 = pnand %p135_p11, %p129_p8 }
  0xa2   :  { %v36_v4 = vpop.xlane.xlu0 %35 }
  0xa3   :  { %v41_v5 = vmul.f32 0.03125, %v36_v4 }
  0xa5   :  { %v43_v6 = vsub.f32 %v29_v0, %v41_v5 }
  0xa6   :  { %v39_v7 = vpop.xlane.xlu0 %38 }
  0xa7   :  { %v42_v8 = vmul.f32 0.03125, %v39_v7  ;;  %v45_v9 = vmul.f32 %v43_v6, %v43_v6 }
  0xa9   :  { %v44_v10 = vsub.f32 %v30_v1, %v42_v8  ;;  %v47_v11 = vsel %vm33_vm0, %v45_v9, 0.0 }
  0xaa   :  { %48 = vadd.xlane.f32.xlu1 %v47_v11 }
  0xab   :  { %v46_v12 = vmul.f32 %v44_v10, %v44_v10 }
  0xad   :  { %v50_v13 = vsel %vm33_vm0, %v46_v12, 0.0 }
  0xae   :  { %51 = vadd.xlane.f32.xlu1 %v50_v13 }
 0x137   :  { %v49_v14 = vpop.xlane.xlu1 %48 }
 0x138   :  { %v53_v15 = vmul.f32 0.03125, %v49_v14 }
 0x13a   :  { %v55_v16 = vadd.f32 1e-12, %v53_v15 }
 0x13b   :  { %v52_v17 = vpop.xlane.xlu1 %51 }
 0x13c   :  { %102 = vrsqrt.f32 %v55_v16  ;;  %v54_v18 = vmul.f32 0.03125, %v52_v17 }
 0x13e   :  { %v56_v19 = vadd.f32 1e-12, %v54_v18 }
 0x140   :  { %104 = vrsqrt.f32 %v56_v19 }
 0x146   :  { %v103_v20 = vpop.eup %102 }
 0x147   :  { %v59_v22 = vmul.f32 %v103_v20, %v43_v6 }
 0x149   :  { %v67_v24 = vmul.f32 %v96_v21, %v59_v22 }
 0x14a   :  { %v105_v25 = vpop.eup %104 }
 0x14b   :  { %v60_v26 = vmul.f32 %v105_v25, %v44_v10  ;;  %v75_v27 = vadd.f32 %v97_v23, %v67_v24 }
 0x14d   :  { %v68_v28 = vmul.f32 %v96_v21, %v60_v26  ;;  %77 = vst.msk [vmem:[#allocation5] sm:$0xff] %vm33_vm0, %v75_v27 }
 0x14f   :  { %v76_v29 = vadd.f32 %v97_v23, %v68_v28 }
 0x151   :  { %78 = vst.msk [vmem:[#allocation5 + $0x8] sm:$0xff] %vm33_vm0, %v76_v29 }
 0x152   :  { %139 = shalt.err (!%p136_p12)
}
 0x153   :  { %s140_s5 = scalar_lea.hbm %s223_s3, 256 }
 0x154   :  { %p141_p13 = scmp.ne.s32.totalorder %s223_s3, %s140_s5  ;;  %p144_p0 = scmp.lt.u32.totalorder %s140_s5, %s223_s3 }
 0x156   :  { %p146_p1 = pnand %p144_p0, %p141_p13 }
 0x158   :  { %149 = shalt.err (!%p146_p1)
}
 0x159   :  { %90 = dma.vmem_to_hbm [thread:$0]  %s85_s30, 256, %s223_s3, [#allocation4], %s155_s22, %s155_s22, %s156_s23  }
 0x15a   :  { %152 = dma.done.wait [#allocation4], 256  }
 0x15b   :  { %153 = vsyncadd [#allocation4], 4294967040 }
 0x15c   :  { %94 = vsyncpa [#allocation3], 1 }
 0x15d   :  { %95 = vsyncpa [#allocation4], 1 }

</bundles_post_ra>
